<compile_context>
chip_gen: v6e
topology: v6e:2x2x1
jax: 0.10.0
libtpu: 0.0.40
codegen_flags: <defaults>
</compile_context>

<pallas_src>
import jax
import jax.numpy as jnp
from jax.experimental import pallas as pl
from jax.experimental.pallas import tpu as pltpu


# ------------------------------------------------------------------ kernel --

def _conv_gemm_bias_elu_kernel(p_ref, w_ref, b_ref, o_ref, acc_ref):
    """One (tm, tn) output tile of ELU(patches @ W + bias); K reduced over grid axis 2."""
    @pl.when(pl.program_id(2) == 0)
    def _():
        acc_ref[...] = jnp.zeros_like(acc_ref)

    acc_ref[...] += jnp.dot(p_ref[...], w_ref[...],
                            preferred_element_type=jnp.float32)

    @pl.when(pl.program_id(2) == pl.num_programs(2) - 1)
    def _():
        y = acc_ref[...] + b_ref[...]                       # bias epilogue (f32)
        # ELU(alpha=1): y if y > 0 else exp(y) - 1  (clamp keeps exp() finite)
        neg = jnp.exp(jnp.minimum(y, 0.0)) - 1.0
        o_ref[...] = jnp.where(y > 0.0, y, neg).astype(o_ref.dtype)


# ---------------------------------------------------------------------- glue --

def _round_up(x, m):
    return ((x + m - 1) // m) * m


def conv3x3_bias_elu(x_nhwc, w_hwio, bias):
    """ReflectionPad2d(1) + Conv2d(cin, cout, 3, bias=True) + ELU, NHWC in/out.

    x_nhwc: (N, H, W, Cin) f32;  w_hwio: (3, 3, Cin, Cout);  bias: (Cout,)
    """
    n, h, w, cin = x_nhwc.shape
    kh, kw, _, cout = w_hwio.shape

    # Reflection pad by 1 (matches nn.ReflectionPad2d(1)).
    xp = jnp.pad(x_nhwc, ((0, 0), (1, 1), (1, 1), (0, 0)), mode='reflect')
    ho, wo = h, w

    # im2col in bf16 (halves HBM bytes); the GEMM below streams it tile-by-tile.
    # TODO(synk): a fully fused conv that DMA's halo'd NHWC tiles directly (no im2col
    # materialization) would remove the remaining 9x patch-buffer HBM traffic.
    taps = [xp[:, ki:ki + ho, kj:kj + wo, :] for ki in range(kh) for kj in range(kw)]
    patches = jnp.stack(taps, axis=3).astype(jnp.bfloat16)        # (N, Ho, Wo, 9, Cin)

    m = n * ho * wo
    k = kh * kw * cin
    patches = patches.reshape(m, k)
    wmat = w_hwio.reshape(k, cout).astype(jnp.bfloat16)

    # ---- tile plan (lane-dense output, aligned K, sublane-aligned M) ----
    tn = 128
    n_pad = _round_up(cout, tn)
    k_pad = _round_up(k, 128)
    tk = 512 if k_pad % 512 == 0 else (256 if k_pad % 256 == 0 else 128)
    tm = min(256, _round_up(m, 8))
    m_pad = _round_up(m, tm)

    patches = jnp.pad(patches, ((0, m_pad - m), (0, k_pad - k)))
    wmat = jnp.pad(wmat, ((0, k_pad - k), (0, n_pad - cout)))
    b2 = jnp.pad(bias.astype(jnp.float32), (0, n_pad - cout)).reshape(1, n_pad)

    grid = (m_pad // tm, n_pad // tn, k_pad // tk)

    cost = pl.CostEstimate(
        flops=2 * m_pad * n_pad * k_pad,
        transcendentals=m_pad * n_pad,
        bytes_accessed=(patches.size * 2 + wmat.size * 2
                        + b2.size * 4 + m_pad * n_pad * 4),
    )

    out = pl.pallas_call(
        _conv_gemm_bias_elu_kernel,
        out_shape=jax.ShapeDtypeStruct((m_pad, n_pad), jnp.float32),
        grid_spec=pltpu.PrefetchScalarGridSpec(
            num_scalar_prefetch=0,
            grid=grid,
            in_specs=[
                pl.BlockSpec((tm, tk), lambda i, j, kk: (i, kk)),   # patches tile
                pl.BlockSpec((tk, tn), lambda i, j, kk: (kk, j)),   # weight tile
                pl.BlockSpec((1, tn), lambda i, j, kk: (0, j)),     # bias (epilogue only)
            ],
            out_specs=pl.BlockSpec((tm, tn), lambda i, j, kk: (i, j)),
            scratch_shapes=[pltpu.VMEM((tm, tn), jnp.float32)],
        ),
        compiler_params=pltpu.CompilerParams(
            dimension_semantics=("parallel", "parallel", "arbitrary"),
            vmem_limit_bytes=48 * 1024 * 1024,
        ),
        cost_estimate=cost,
    )(patches, wmat, b2)

    return out[:m, :cout].reshape(n, ho, wo, cout)


def conv_block_forward(x_nchw, w_hwio, bias):
    """Mirrors ConvBlock.forward: Conv3x3 (reflection pad) + ELU.  NCHW in, NCHW out."""
    x = jnp.transpose(x_nchw.astype(jnp.float32), (0, 2, 3, 1))   # NCHW -> NHWC
    y = conv3x3_bias_elu(x, w_hwio, bias)
    return jnp.transpose(y, (0, 3, 1, 2))                          # NHWC -> NCHW


# ---------------------------------------------------------------- reference --

def _reference(x_nchw, w_hwio, bias):
    """Pure-JAX f32 reference of ConvBlock.forward."""
    xp = jnp.pad(x_nchw, ((0, 0), (0, 0), (1, 1), (1, 1)), mode='reflect')
    w_oihw = jnp.transpose(w_hwio, (3, 2, 0, 1))
    y = jax.lax.conv_general_dilated(
        xp, w_oihw, window_strides=(1, 1), padding='VALID',
        dimension_numbers=('NCHW', 'OIHW', 'NCHW'),
        precision=jax.lax.Precision.HIGHEST)
    y = y + bias.reshape(1, -1, 1, 1)
    return jnp.where(y > 0.0, y, jnp.exp(jnp.minimum(y, 0.0)) - 1.0)


# --------------------------------------------------------------------- main --

if __name__ == "__main__":
    key = jax.random.PRNGKey(0)
    k_x, k_w, k_b = jax.random.split(key, 3)

    batch, cin, cout, hw = 2, 4, 8, 16

    # deterministic synthetic inputs / params (PyTorch-like uniform init bounds)
    x = jax.random.uniform(k_x, (batch, cin, hw, hw), dtype=jnp.float32)
    fan_in = cin * 3 * 3
    bound = 1.0 / (fan_in ** 0.5)
    w_hwio = jax.random.uniform(k_w, (3, 3, cin, cout), jnp.float32, -bound, bound)
    bias = jax.random.uniform(k_b, (cout,), jnp.float32, -bound, bound)

    out = conv_block_forward(x, w_hwio, bias)
    out = jax.block_until_ready(out)

    assert out.shape == (batch, cout, hw, hw), out.shape
    assert bool(jnp.all(jnp.isfinite(out)))

    ref = _reference(x, w_hwio, bias)
    max_err = float(jnp.max(jnp.abs(out - ref)))
    assert max_err < 5e-2, f"max abs err vs reference: {max_err}"

    print("KERNEL_OK")
</pallas_src>

<mosaic_0001>
module attributes {stable_mosaic.version = 11 : i64} {
  func.func @_conv_gemm_bias_elu_kernel(%arg0: i32, %arg1: i32, %arg2: i32, %arg3: memref<256x128xbf16, #tpu.memory_space<vmem>>, %arg4: memref<128x128xbf16, #tpu.memory_space<vmem>>, %arg5: memref<1x128xf32, #tpu.memory_space<vmem>>, %arg6: memref<256x128xf32, #tpu.memory_space<vmem>>, %arg7: memref<256x128xf32, #tpu.memory_space<vmem>>) attributes {dimension_semantics = [#tpu.dimension_semantics<parallel>, #tpu.dimension_semantics<parallel>, #tpu.dimension_semantics<arbitrary>], iteration_bounds = array<i64: 2, 1, 1>, scalar_prefetch = 0 : i64, scratch_operands = 1 : i64, tpu.core_type = #tpu.core_type<tc>, window_params = [{transform_indices = @transform_0, window_bounds = array<i64: 256, 128>}, {transform_indices = @transform_1, window_bounds = array<i64: 128, 128>}, {transform_indices = @transform_2, window_bounds = array<i64: 1, 128>}, {transform_indices = @transform_3, window_bounds = array<i64: 256, 128>}]} {
    %c0_i32 = arith.constant 0 : i32
    %0 = arith.cmpi eq, %arg2, %c0_i32 : i32
    %1 = arith.extui %0 : i1 to i32
    %c0_i32_0 = arith.constant 0 : i32
    %2 = arith.cmpi ne, %1, %c0_i32_0 : i32
    scf.if %2 {
      %cst_10 = arith.constant 0.000000e+00 : f32
      %12 = vector.broadcast %cst_10 : f32 to vector<256x128xf32>
      %c0_11 = arith.constant 0 : index
      %c0_12 = arith.constant 0 : index
      %13 = vector.load %arg7[%c0_11, %c0_12] : memref<256x128xf32, #tpu.memory_space<vmem>>, vector<256x128xf32>
      tpu.vector_store %arg7[%c0_11, %c0_12], %12 {strides = array<i32>} : memref<256x128xf32, #tpu.memory_space<vmem>>, vector<256x128xf32>,
    } else {
    }
    %c0 = arith.constant 0 : index
    %c0_1 = arith.constant 0 : index
    %3 = vector.load %arg7[%c0, %c0_1] : memref<256x128xf32, #tpu.memory_space<vmem>>, vector<256x128xf32>
    %c0_2 = arith.constant 0 : index
    %c0_3 = arith.constant 0 : index
    %4 = vector.load %arg3[%c0_2, %c0_3] : memref<256x128xbf16, #tpu.memory_space<vmem>>, vector<256x128xbf16>
    %c0_4 = arith.constant 0 : index
    %c0_5 = arith.constant 0 : index
    %5 = vector.load %arg4[%c0_4, %c0_5] : memref<128x128xbf16, #tpu.memory_space<vmem>>, vector<128x128xbf16>
    %cst = arith.constant dense<0.000000e+00> : vector<256x128xf32>
    %6 = tpu.matmul %4, %5, %cst {dimension_numbers = #tpu.dot_dimension_numbers<[1], [0], [0], [1], [0, 0, 1, 1], [], []>} : vector<256x128xbf16>, vector<128x128xbf16>, vector<256x128xf32> -> vector<256x128xf32>
    %7 = arith.addf %3, %6 : vector<256x128xf32>
    %c0_6 = arith.constant 0 : index
    %c0_7 = arith.constant 0 : index
    %8 = vector.load %arg7[%c0_6, %c0_7] : memref<256x128xf32, #tpu.memory_space<vmem>>, vector<256x128xf32>
    tpu.vector_store %arg7[%c0_6, %c0_7], %7 {strides = array<i32>} : memref<256x128xf32, #tpu.memory_space<vmem>>, vector<256x128xf32>,
    %c0_i32_8 = arith.constant 0 : i32
    %9 = arith.cmpi eq, %arg2, %c0_i32_8 : i32
    %10 = arith.extui %9 : i1 to i32
    %c0_i32_9 = arith.constant 0 : i32
    %11 = arith.cmpi ne, %10, %c0_i32_9 : i32
    scf.if %11 {
      %c0_10 = arith.constant 0 : index
      %c0_11 = arith.constant 0 : index
      %12 = vector.load %arg7[%c0_10, %c0_11] : memref<256x128xf32, #tpu.memory_space<vmem>>, vector<256x128xf32>
      %c0_12 = arith.constant 0 : index
      %c0_13 = arith.constant 0 : index
      %13 = vector.load %arg5[%c0_12, %c0_13] : memref<1x128xf32, #tpu.memory_space<vmem>>, vector<1x128xf32>
      %14 = vector.broadcast %13 : vector<1x128xf32> to vector<256x128xf32>
      %15 = arith.addf %12, %14 : vector<256x128xf32>
      %cst_14 = arith.constant 0.000000e+00 : f32
      %16 = vector.broadcast %cst_14 : f32 to vector<256x128xf32>
      %17 = arith.minimumf %15, %16 : vector<256x128xf32>
      %18 = math.exp %17 : vector<256x128xf32>
      %cst_15 = arith.constant 1.000000e+00 : f32
      %19 = vector.broadcast %cst_15 : f32 to vector<256x128xf32>
      %20 = arith.subf %18, %19 : vector<256x128xf32>
      %cst_16 = arith.constant 0.000000e+00 : f32
      %21 = vector.broadcast %cst_16 : f32 to vector<256x128xf32>
      %22 = arith.cmpf ogt, %15, %21 : vector<256x128xf32>
      %23 = arith.select %22, %15, %20 : vector<256x128xi1>, vector<256x128xf32>
      %c0_17 = arith.constant 0 : index
      %c0_18 = arith.constant 0 : index
      %24 = vector.load %arg6[%c0_17, %c0_18] : memref<256x128xf32, #tpu.memory_space<vmem>>, vector<256x128xf32>
      tpu.vector_store %arg6[%c0_17, %c0_18], %23 {strides = array<i32>} : memref<256x128xf32, #tpu.memory_space<vmem>>, vector<256x128xf32>,
    } else {
    }
    return
  }
  func.func @transform_0(%arg0: i32, %arg1: i32, %arg2: i32) -> (i32, i32) {
    %c0_i32 = arith.constant 0 : i32
    return %arg0, %arg2 : i32, i32
  }
  func.func @transform_1(%arg0: i32, %arg1: i32, %arg2: i32) -> (i32, i32) {
    %c0_i32 = arith.constant 0 : i32
    return %arg2, %arg1 : i32, i32
  }
  func.func @transform_2(%arg0: i32, %arg1: i32, %arg2: i32) -> (i32, i32) {
    %c0_i32 = arith.constant 0 : i32
    %c0_i32_0 = arith.constant 0 : i32
    return %c0_i32, %arg1 : i32, i32
  }
  func.func @transform_3(%arg0: i32, %arg1: i32, %arg2: i32) -> (i32, i32) {
    %c0_i32 = arith.constant 0 : i32
    return %arg0, %arg1 : i32, i32
  }
}

</mosaic_0001>

<bundles_post_ra>
// kernel: tpu_custom_call.1
= control target key start
LH: loop header
LB: loop body
LE: loop exit
PB: predicated region body
PF: predicated region fallthrough
CT: control target
= control target key end

     0   :  { %8 = vsyncpa [#allocation4], 0  ;;  %s2144_s0 = inlined_call_operand.hbm [shape: bf16[512,128], index: 0, kind: input, shape index: {}]   ;;  %s2145_s1 = inlined_call_operand.hbm [shape: bf16[128,128], index: 1, kind: input, shape index: {}]   ;;  %s2146_s2 = inlined_call_operand.vmem [shape: f32[1,128], index: 2, kind: input, shape index: {}]   ;;  %s2147_s3 = inlined_call_operand.hbm [shape: f32[512,128], index: 3, kind: output, shape index: {}]  }
   0x1   :  { %10 = vsyncpa [#allocation4 + $0x1], 0 }
   0x2   :  { %11 = vsyncpa [#allocation7], 0 }
   0x3   :  { %12 = vsyncpa [#allocation5], 0 }
   0x4   :  { %14 = vsyncpa [#allocation5 + $0x1], 0  ;;  %s1666_s12 = smov 0   ;;  %s1668_s13 = smov 0  }
   0x5   :  { %s1670_s14 = smov 0   ;;  %s1672_s15 = smov 0  }
   0x6   :  { %s1674_s16 = smov 0   ;;  %s1676_s17 = smov 0  }
   0x7 LB: > { %s1169_s18 = sadd.s32 4294967295, %s1637_s17   ;;  %s1170_s19 = sadd.s32 4294967294, %s1637_s17   ;;  %s1637_s17 = sphi %s1676_s17, %s20_s17   ;;  %s1633_s16 = sphi %s1674_s16, %s2169_s16   ;;  %s1629_s15 = sphi %s1672_s15, %s2168_s15   ;;  %s1625_s14 = sphi %s1670_s14, %s2167_s14   ;;  %s1621_s13 = sphi %s1668_s13, %s2166_s13   ;;  %s1617_s12 = sphi %s1666_s12, %s2165_s12  }
   0x8   : > { %p61_p0 = scmp.ne.s32.totalorder %s1621_s13, %s1617_s12  ;;  %p1700_p1 = scmp.eq.s32.totalorder %s1169_s18, 0 }
   0x9   : > { %p1704_p2 = scmp.eq.s32.totalorder %s1169_s18, 1  ;;  %p147_p3 = scmp.eq.s32.totalorder %s1170_s19, 1 }
   0xa   : > { %p1710_p4 = por %p1700_p1, %p61_p0  ;;  %p1171_p5 = scmp.ge.s32.totalorder %s1637_s17, 1 }
   0xb   : > { %p1715_p6 = por %p147_p3, %p61_p0  ;;  %p154_p7 = scmp.lt.s32.totalorder %s1637_s17, 3 }
   0xc   : > { %s2153_s22 = scalar_select %p1710_p4, 1, 0 }
   0xd   : > { %s2154_s23 = scalar_select %p1715_p6, 1, 0 }
   0xe   : > { %p1720_p8 = pnand %p1171_p5, %p154_p7  ;;  %s1639_s25 = smov [#allocation6]  }
   0xf   : > { %s170_s26 = sshll.u32 %s1639_s25, 4  ;;  %s39_s28 = sadd.s32 1, %s1633_s16  ;;  %s171_s26 = int_to_ptr.vmem [resolvable:$true] %s170_s26 }
  0x10   : > { %p1342_p9 = pneg %p1720_p8  ;;  %s1510_s29 = scalar_lea.vmem %s171_s26, 1024 }
  0x11   : > { %p1511_p13 = scmp.ne.s32.totalorder %s171_s26, %s1510_s29  ;;  %p1518_p5 = scmp.lt.s32.totalorder %s171_s26, %s171_s26 }
  0x12   : > { %p1729_p11 = pnand %p1342_p9, %p1700_p1  ;;  %p1519_p7 = scmp.lt.s32.totalorder %s1510_s29, %s1510_s29 }
  0x14   : > { %p1501_p12 = pneg %p1729_p11  ;;  %p1520_p6 = por %p1519_p7, %p1518_p5 }
  0x16   : > { %p1513_p0 = pnand %p1511_p13, %p1501_p12 }
  0x18   : > { %p1514_p3 = pneg %p1513_p0 }
  0x1a   : > { %p1521_p4 = pnand %p1520_p6, %p1514_p3 }
  0x1c   : > { %1524 = shalt.err (!%p1521_p4)
}
  0x1d   : > { %s2149_s30 = smov 64   ;;  %s2150_s4 = smov 4  }
  0x1e   : > { %1345 = dma.hbm_to_vmem [thread:$0]  (!%p1729_p11), %s2145_s1, 1024, %s171_s26, [#allocation7], %s2149_s30, %s2149_s30, %s2150_s4  }
  0x1f   : > { %p41_p4 = scmp.ge.s32.totalorder %s39_s28, 2  ;;  %s48_s7 = sadd.s32 1, %s1625_s14 }
  0x20   : > { %p55_p6 = scmp.ne.s32.totalorder %s1625_s14, %s1621_s13  ;;  %p56_p9 = scmp.eq.s32.totalorder %s1637_s17, 0 }
  0x21   : > { %s2171_s28 = smov (%p41_p4, %s39_s28), 0  ;;  %p1355_p0 = scmp.lt.s32.totalorder %s1637_s17, 2 }
  0x22   : > { %p1750_p12 = por %p56_p9, %p55_p6  ;;  %p1756_p13 = por %p1704_p2, %p55_p6 }
  0x23   : > { %s43_s10 = ssub.s32 %s1633_s16, %s2171_s28  ;;  %s190_s11 = sand.u32 1, %s1625_s14  }
  0x24   : > { %p46_p11 = scmp.eq.s32.totalorder %s43_s10, 0  ;;  %s1175_s18 = sshll.u32 %s190_s11, 7 }
  0x25   : > { %s1244_s25 = sshll.u32 %s1633_s16, 11  ;;  %s194_s5 = scalar_lea.vmem [#allocation3], %s1175_s18 }
  0x26   : > { %s1765_s19 = scalar_select %p46_p11, %s1625_s14, %s48_s7  }
  0x27   : > { %s201_s29 = scalar_lea.hbm %s2144_s0, %s1244_s25  ;;  %s202_s6 = sshll.u32 %s194_s5, 4  ;;  %s203_s6 = int_to_ptr.vmem [resolvable:$true] %s202_s6 }
  0x28   : > { %p1773_p2 = pnand %p1355_p0, %p1750_p12  ;;  %s191_s30 = scalar_lea.sflag [#allocation4], %s190_s11 }
  0x29   : > { %s1538_s10 = scalar_lea.vmem %s203_s6, 2048  ;;  %s1642_s7 = smov [#allocation3]  }
  0x2a   : > { %p1527_p3 = pneg %p1773_p2  ;;  %p1539_p5 = scmp.ne.s32.totalorder %s203_s6, %s1538_s10 }
  0x2b   : > { %s1543_s4 = sshll.u32 %s1642_s7, 4  ;;  %s1544_s4 = int_to_ptr.vmem [resolvable:$false] %s1543_s4 }
  0x2c   : > { %p1541_p7 = pnand %p1539_p5, %p1527_p3  ;;  %s1545_s25 = scalar_lea.vmem %s1544_s4, 4096 }
  0x2d   : > { %p1546_p6 = scmp.lt.s32.totalorder %s203_s6, %s1544_s4  ;;  %p1547_p9 = scmp.lt.s32.totalorder %s1545_s25, %s1538_s10 }
  0x2e   : > { %p1542_p4 = pneg %p1541_p7 }
  0x2f   : > { %p1548_p11 = por %p1547_p9, %p1546_p6 }
  0x31   : > { %p1549_p10 = pnand %p1548_p11, %p1542_p4 }
  0x33   : > { %1552 = shalt.err (!%p1549_p10)
}
  0x34   : > { %s2160_s8 = smov 4   ;;  %s2161_s18 = smov 64  }
  0x35   : > { %1349 = dma.hbm_to_vmem [thread:$0]  (!%p1773_p2), %s201_s29, 2048, %s203_s6, %s191_s30, %s2161_s18, %s2161_s18, %s2160_s8  }
  0x36   : > { %214 = sbr.rel (%p1720_p8) target bundleno = 371 (0x173), region = 32  ;;  %s1787_s11 = sand.u32 (!%p1720_p8), 1, %s1621_s13  }
  0x37   : > { %s1179_s4 = sshll.u32 (!%p1720_p8), %s1787_s11, 7  ;;  %s217_s26 = scalar_lea.sflag (!%p1720_p8), [#allocation4], %s1787_s11 }
  0x38   : > { %s1791_s27 = scalar_lea.vmem (!%p1720_p8), [#allocation3], %s1179_s4  ;;  %p2162_p10 = scmp.ne.s32.totalorder (!%p1720_p8), %s2153_s22, 0 }
  0x3b   : > { %1604 = dma.done.wait (%p2162_p10), %s217_s26, 2048  }
  0x3c   : > { %1606 = vsyncadd (%p2162_p10), %s217_s26, 4294965248 }
  0x3d   : > { %1608 = dma.done.wait (%p1700_p1), [#allocation7], 1024  }
  0x3e   : > { %1610 = vsyncadd (%p1700_p1), [#allocation7], 4294966272  ;;  %v1411_v0 = vld [vmem:[#allocation6 + $0x38] sm:$0xff]   ;;  %v1412_v1 = vld [vmem:[#allocation6 + $0x30] sm:$0xff]   ;;  %s1181_s24 = sshll.u32 %s1787_s11, 8  ;;  %s1245_s29 = sshll.u32 %s1629_s15, 12 }
  0x3f   : > { %1270 = vmatprep.subr.bf16.mxu0 %v1411_v0  ;;  %1318 = vmatprep.subr.bf16.mxu1 %v1411_v0  ;;  %v1413_v2 = vld [vmem:[#allocation6 + $0x28] sm:$0xff]   ;;  %v1414_v3 = vld [vmem:[#allocation6 + $0x20] sm:$0xff]   ;;  %v1415_v6 = vld [vmem:[#allocation6 + $0x18] sm:$0xff]   ;;  %s1907_s30 = scalar_lea.vmem [#allocation8], %s1181_s24  ;;  %s2090_s10 = scalar_lea.hbm %s2147_s3, %s1245_s29 }
  0x40   : > { %1271 = vmatpush3.bf16.msra.mxu0 %v1411_v0  ;;  %1326 = vmatpush3.bf16.msra.mxu1 %v1411_v0  ;;  %v1419_v4 = vld [vmem:[%s1791_s27] sm:$0xff]   ;;  %v1416_v7 = vld [vmem:[#allocation6 + $0x10] sm:$0xff]   ;;  %v1417_v8 = vld [vmem:[#allocation6 + $0x8] sm:$0xff]   ;;  %s1055_s5 = sshll.u32 %s1907_s30, 4  ;;  %s1041_s15 = scalar_lea.sflag [#allocation5], %s1787_s11  ;;  %s2092_s5 = int_to_ptr.vmem [resolvable:$true] %s1055_s5 }
  0x41   : > { %1272 = vmatprep.subr.bf16.mxu0 %v1412_v1  ;;  %1319 = vmatprep.subr.bf16.mxu1 %v1412_v1  ;;  %v1420_v5 = vld [vmem:[%s1791_s27 + $0x40] sm:$0xff]   ;;  %v1421_v10 = vld [vmem:[%s1791_s27 + $0x8] sm:$0xff]   ;;  %v1423_v12 = vld [vmem:[%s1791_s27 + $0x10] sm:$0xff]   ;;  %s1553_s7 = scalar_lea.vmem %s2092_s5, 4096  ;;  %s1643_s25 = smov [#allocation8]  }
  0x42   : > { %1286 = vmatprep.mubr.bf16.mxu0 %v1419_v4  ;;  %1302 = vmatprep.mubr.bf16.mxu1 %v1420_v5  ;;  %v1418_v9 = vld [vmem:[#allocation6] sm:$0xff]   ;;  %v1422_v11 = vld [vmem:[%s1791_s27 + $0x48] sm:$0xff]   ;;  %v1424_v13 = vld [vmem:[%s1791_s27 + $0x50] sm:$0xff]   ;;  %p1554_p1 = scmp.ne.s32.totalorder %s2092_s5, %s1553_s7  ;;  %s1557_s8 = sshll.u32 %s1643_s25, 4  ;;  %s1558_s8 = int_to_ptr.vmem [resolvable:$false] %s1557_s8 }
  0x43   : > { %v1425_v14 = vld [vmem:[%s1791_s27 + $0x18] sm:$0xff]   ;;  %v1427_v16 = vld [vmem:[%s1791_s27 + $0x20] sm:$0xff]   ;;  %v1429_v18 = vld [vmem:[%s1791_s27 + $0x28] sm:$0xff]   ;;  %s1559_s18 = scalar_lea.vmem %s1558_s8, 8192  ;;  %p1560_p0 = scmp.lt.s32.totalorder %s2092_s5, %s1558_s8 }
  0x44   : > { %1273 = vmatpush3.bf16.msra.mxu0 %v1412_v1  ;;  %1327 = vmatpush3.bf16.msra.mxu1 %v1412_v1  ;;  %v1426_v15 = vld [vmem:[%s1791_s27 + $0x58] sm:$0xff]   ;;  %v1428_v17 = vld [vmem:[%s1791_s27 + $0x60] sm:$0xff]   ;;  %v1430_v19 = vld [vmem:[%s1791_s27 + $0x68] sm:$0xff]   ;;  %p1555_p8 = pnand %p1554_p1, %p1756_p13  ;;  %p1561_p2 = scmp.lt.s32.totalorder %s1559_s18, %s1553_s7 }
  0x45   : > { %1274 = vmatprep.subr.bf16.mxu0 %v1413_v2  ;;  %1320 = vmatprep.subr.bf16.mxu1 %v1413_v2  ;;  %v1431_v20 = vld [vmem:[%s1791_s27 + $0x30] sm:$0xff]   ;;  %v1433_v22 = vld [vmem:[%s1791_s27 + $0x38] sm:$0xff]   ;;  %v1820_v24 = vld [vmem:[%s2146_s2] ss:$0 sm:$0xff] }
  0x46   : > { %v1432_v21 = vld [vmem:[%s1791_s27 + $0x70] sm:$0xff]   ;;  %v1434_v23 = vld [vmem:[%s1791_s27 + $0x78] sm:$0xff]   ;;  %p1556_p12 = pneg %p1555_p8  ;;  %p1562_p3 = por %p1561_p2, %p1560_p0 }
  0x48   : > { %1275 = vmatpush3.bf16.msra.mxu0 %v1413_v2  ;;  %1328 = vmatpush3.bf16.msra.mxu1 %v1413_v2  ;;  %p1563_p5 = pnand %p1562_p3, %p1556_p12 }
  0x49   : > { %1276 = vmatprep.subr.bf16.mxu0 %v1414_v3  ;;  %1321 = vmatprep.subr.bf16.mxu1 %v1414_v3 }
  0x4c   : > { %1277 = vmatpush3.bf16.msra.mxu0 %v1414_v3  ;;  %1329 = vmatpush3.bf16.msra.mxu1 %v1414_v3 }
  0x4d   : > { %1278 = vmatprep.subr.bf16.mxu0 %v1415_v6  ;;  %1322 = vmatprep.subr.bf16.mxu1 %v1415_v6 }
  0x50   : > { %1279 = vmatpush3.bf16.msra.mxu0 %v1415_v6  ;;  %1330 = vmatpush3.bf16.msra.mxu1 %v1415_v6 }
  0x51   : > { %1280 = vmatprep.subr.bf16.mxu0 %v1416_v7  ;;  %1323 = vmatprep.subr.bf16.mxu1 %v1416_v7 }
  0x54   : > { %1281 = vmatpush3.bf16.msra.mxu0 %v1416_v7  ;;  %1331 = vmatpush3.bf16.msra.mxu1 %v1416_v7 }
  0x55   : > { %1282 = vmatprep.subr.bf16.mxu0 %v1417_v8  ;;  %1324 = vmatprep.subr.bf16.mxu1 %v1417_v8 }
  0x58   : > { %1283 = vmatpush3.bf16.msra.mxu0 %v1417_v8  ;;  %1332 = vmatpush3.bf16.msra.mxu1 %v1417_v8 }
  0x59   : > { %1284 = vmatprep.subr.bf16.mxu0 %v1418_v9  ;;  %1325 = vmatprep.subr.bf16.mxu1 %v1418_v9 }
  0x5c   : > { %1285 = vmatpush3.bf16.msra.mxu0 %v1418_v9  ;;  %1333 = vmatpush3.bf16.msra.mxu1 %v1418_v9 }
  0x5f   : > { %1287 = vmatmul.mubr.bf16.vlgmr.msra.gmra.mxu0 %v1421_v10  ;;  %1303 = vmatmul.mubr.bf16.vlgmr.msra.gmra.mxu1 %v1422_v11 }
  0x60   : > { %1290 = vmatprep.mubr.bf16.mxu0 %v1423_v12  ;;  %1306 = vmatprep.mubr.bf16.mxu1 %v1424_v13 }
  0x67   : > { %1291 = vmatmul.mubr.bf16.gmra.mxu0 %v1425_v14  ;;  %1307 = vmatmul.mubr.bf16.gmra.mxu1 %v1426_v15 }
  0x68   : > { %1294 = vmatprep.mubr.bf16.mxu0 %v1427_v16  ;;  %1310 = vmatprep.mubr.bf16.mxu1 %v1428_v17 }
  0x6f   : > { %1295 = vmatmul.mubr.bf16.gmra.mxu0 %v1429_v18  ;;  %1311 = vmatmul.mubr.bf16.gmra.mxu1 %v1430_v19 }
  0x70   : > { %1298 = vmatprep.mubr.bf16.mxu0 %v1431_v20  ;;  %1314 = vmatprep.mubr.bf16.mxu1 %v1432_v21 }
  0x77   : > { %1299 = vmatmul.mubr.bf16.gmra.mxu0 %v1433_v22  ;;  %1315 = vmatmul.mubr.bf16.gmra.mxu1 %v1434_v23 }
 0x11f   : > { %v1288_v25 = vpop.f32.mrf.mxu0  ;;  %v1304_v26 = vpop.f32.mrf.mxu1 }
 0x120   : > { %v1823_v27 = vadd.f32 %v1288_v25, %v1820_v24  ;;  %v1826_v28 = vadd.f32 %v1304_v26, %v1820_v24 }
 0x121   : > { %v551_v29 = vpop.f32.mrf.mxu0  ;;  %v615_v30 = vpop.f32.mrf.mxu1 }
 0x122   : > { %v818_v31 = vmin.f32 %v1823_v27, 0.0  ;;  %v834_v32 = vmin.f32 %v1826_v28, 0.0  ;;  %v1831_v33 = vadd.f32 %v1820_v24, %v551_v29  ;;  %v1834_v34 = vadd.f32 %v1820_v24, %v615_v30 }
 0x123   : > { %v1289_v35 = vpop.f32.mrf.mxu0  ;;  %v1305_v36 = vpop.f32.mrf.mxu1  ;;  %vm946_vm0 = vcmp.gt.f32.partialorder %v1823_v27, 0.0  ;;  %vm962_vm1 = vcmp.gt.f32.partialorder %v1826_v28, 0.0 }
 0x124   : > { %v852_v37 = vmul.f32 1.442695, %v818_v31  ;;  %v884_v38 = vmul.f32 1.442695, %v834_v32  ;;  %v1837_v39 = vadd.f32 %v1289_v35, %v1820_v24  ;;  %v1840_v40 = vadd.f32 %v1305_v36, %v1820_v24 }
 0x125   : > { %v816_v41 = vmin.f32 %v1831_v33, 0.0  ;;  %v832_v42 = vmin.f32 %v1834_v34, 0.0  ;;  %v554_v43 = vpop.f32.mrf.mxu0  ;;  %v618_v44 = vpop.f32.mrf.mxu1  ;;  %vm944_vm2 = vcmp.gt.f32.partialorder %v1831_v33, 0.0  ;;  %vm960_vm3 = vcmp.gt.f32.partialorder %v1834_v34, 0.0 }
 0x126   : > { %1435 = vpow2.f32 %v852_v37  ;;  %v819_v45 = vmin.f32 %v1837_v39, 0.0  ;;  %v835_v46 = vmin.f32 %v1840_v40, 0.0  ;;  %v1847_v53 = vadd.f32 %v1820_v24, %v554_v43 }
 0x127   : > { %1437 = vpow2.f32 %v884_v38  ;;  %v848_v47 = vmul.f32 1.442695, %v816_v41  ;;  %v880_v48 = vmul.f32 1.442695, %v832_v42  ;;  %v1292_v49 = vpop.f32.mrf.mxu0  ;;  %v1308_v50 = vpop.f32.mrf.mxu1  ;;  %v1850_v54 = vadd.f32 %v1820_v24, %v618_v44 }
 0x128   : > { %v854_v51 = vmul.f32 1.442695, %v819_v45  ;;  %v886_v52 = vmul.f32 1.442695, %v835_v46  ;;  %v1853_v55 = vadd.f32 %v1292_v49, %v1820_v24  ;;  %v1856_v56 = vadd.f32 %v1308_v50, %v1820_v24 }
 0x129   : > { %1439 = vpow2.f32 %v848_v47  ;;  %v567_v57 = vpop.f32.mrf.mxu0  ;;  %v631_v58 = vpop.f32.mrf.mxu1  ;;  %v817_v59 = vmin.f32 %v1847_v53, 0.0  ;;  %v833_v60 = vmin.f32 %v1850_v54, 0.0  ;;  %vm947_vm4 = vcmp.gt.f32.partialorder %v1837_v39, 0.0 }
 0x12a   : > { %1441 = vpow2.f32 %v880_v48  ;;  %v822_v61 = vmin.f32 %v1853_v55, 0.0  ;;  %v838_v2 = vmin.f32 %v1856_v56, 0.0  ;;  %v1863_v4 = vadd.f32 %v1820_v24, %v567_v57 }
 0x12b   : > { %1443 = vpow2.f32 %v854_v51  ;;  %v1293_v62 = vpop.f32.mrf.mxu0  ;;  %v1309_v63 = vpop.f32.mrf.mxu1  ;;  %v850_v0 = vmul.f32 1.442695, %v817_v59  ;;  %v882_v1 = vmul.f32 1.442695, %v833_v60  ;;  %v1866_v5 = vadd.f32 %v1820_v24, %v631_v58 }
 0x12c   : > { %1445 = vpow2.f32 %v886_v52  ;;  %v860_v3 = vmul.f32 1.442695, %v822_v61  ;;  %v892_v8 = vmul.f32 1.442695, %v838_v2  ;;  %v1869_v9 = vadd.f32 %v1293_v62, %v1820_v24 }
 0x12d   : > { %v570_v6 = vpop.f32.mrf.mxu0  ;;  %v634_v7 = vpop.f32.mrf.mxu1  ;;  %1447 = vpow2.f32 %v850_v0  ;;  %v1872_v10 = vadd.f32 %v1309_v63, %v1820_v24  ;;  %v820_v11 = vmin.f32 %v1863_v4, 0.0  ;;  %v836_v12 = vmin.f32 %v1866_v5, 0.0 }
 0x12e   : > { %1449 = vpow2.f32 %v882_v1  ;;  %v823_v13 = vmin.f32 %v1869_v9, 0.0  ;;  %v1885_v20 = vadd.f32 %v1820_v24, %v570_v6  ;;  %v1888_v21 = vadd.f32 %v1820_v24, %v634_v7 }
 0x12f   : > { %1451 = vpow2.f32 %v860_v3  ;;  %v1296_v14 = vpop.f32.mrf.mxu0  ;;  %v856_v15 = vmul.f32 1.442695, %v820_v11  ;;  %v888_v16 = vmul.f32 1.442695, %v836_v12  ;;  %v839_v17 = vmin.f32 %v1872_v10, 0.0  ;;  %v1312_v18 = vpop.f32.mrf.mxu1 }
 0x130   : > { %1453 = vpow2.f32 %v892_v8  ;;  %v862_v19 = vmul.f32 1.442695, %v823_v13  ;;  %vm963_vm5 = vcmp.gt.f32.partialorder %v1840_v40, 0.0  ;;  %v1892_v25 = vadd.f32 %v1296_v14, %v1820_v24 }
 0x131   : > { %1455 = vpow2.f32 %v856_v15  ;;  %v894_v23 = vmul.f32 1.442695, %v839_v17  ;;  %v821_v30 = vmin.f32 %v1885_v20, 0.0  ;;  %v1896_v31 = vadd.f32 %v1312_v18, %v1820_v24  ;;  %v583_v32 = vpop.f32.mrf.mxu0  ;;  %v647_v37 = vpop.f32.mrf.mxu1 }
 0x132   : > { %1457 = vpow2.f32 %v888_v16  ;;  %vm945_vm6 = vcmp.gt.f32.partialorder %v1847_v53, 0.0  ;;  %v837_v36 = vmin.f32 %v1888_v21, 0.0  ;;  %vm961_vm7 = vcmp.gt.f32.partialorder %v1850_v54, 0.0 }
 0x133   : > { %v1436_v22 = vpop.eup %1435  ;;  %1459 = vpow2.f32 %v862_v19  ;;  %v858_v42 = vmul.f32 1.442695, %v821_v30  ;;  %v826_v43 = vmin.f32 %v1892_v25, 0.0  ;;  %vm950_vm8 = vcmp.gt.f32.partialorder %v1853_v55, 0.0  ;;  %v1297_v51 = vpop.f32.mrf.mxu0 }
 0x134   : > { %v1438_v26 = vpop.eup %1437  ;;  %v1209_v29 = vadd.f32 -1.0, %v1436_v22  ;;  %1461 = vpow2.f32 %v894_v23  ;;  %v842_v50 = vmin.f32 %v1896_v31, 0.0  ;;  %vm966_vm9 = vcmp.gt.f32.partialorder %v1856_v56, 0.0  ;;  %v1313_v58 = vpop.f32.mrf.mxu1 }
 0x135   : > { %v1225_v35 = vadd.f32 -1.0, %v1438_v26  ;;  %1463 = vpow2.f32 %v858_v42  ;;  %v868_v49 = vmul.f32 1.442695, %v826_v43  ;;  %v1929_v63 = vadd.f32 %v1820_v24, %v583_v32  ;;  %v586_v6 = vpop.f32.mrf.mxu0 }
 0x136   : > { %v1440_v38 = vpop.eup %1439  ;;  %v978_v41 = vsel %vm946_vm0, %v1823_v27, %v1209_v29  ;;  %v890_v27 = vmul.f32 1.442695, %v837_v36  ;;  %v900_v61 = vmul.f32 1.442695, %v842_v50  ;;  %v1932_v0 = vadd.f32 %v1820_v24, %v647_v37  ;;  %v650_v13 = vpop.f32.mrf.mxu1 }
 0x137   : > { %v1442_v44 = vpop.eup %1441  ;;  %1010 = vst [vmem:[%s1907_s30 + $0x10] sm:$0xff] %v978_v41  ;;  %v994_v45 = vsel %vm962_vm1, %v1826_v28, %v1225_v35  ;;  %v1207_v46 = vadd.f32 -1.0, %v1440_v38  ;;  %v1935_v1 = vadd.f32 %v1297_v51, %v1820_v24  ;;  %vm948_vm10 = vcmp.gt.f32.partialorder %v1863_v4, 0.0  ;;  %v1300_v30 = vpop.f32.mrf.mxu0 }
 0x138   : > { %v1444_v47 = vpop.eup %1443  ;;  %1026 = vst [vmem:[%s1907_s30 + $0x90] sm:$0xff] %v994_v45  ;;  %v1223_v48 = vadd.f32 -1.0, %v1442_v44  ;;  %1465 = vpow2.f32 %v890_v27  ;;  %v824_v11 = vmin.f32 %v1929_v63, 0.0  ;;  %v840_v12 = vmin.f32 %v1932_v0, 0.0  ;;  %v1316_v36 = vpop.f32.mrf.mxu1 }
 0x139   : > { %v1446_v52 = vpop.eup %1445  ;;  %v976_v57 = vsel %vm944_vm2, %v1831_v33, %v1207_v46  ;;  %v1210_v28 = vadd.f32 -1.0, %v1444_v47  ;;  %1467 = vpow2.f32 %v868_v49  ;;  %vm964_vm11 = vcmp.gt.f32.partialorder %v1866_v5, 0.0  ;;  %v599_v47 = vpop.f32.mrf.mxu0 }
 0x13a   : > { %1008 = vst [vmem:[%s1907_s30] sm:$0xff] %v976_v57  ;;  %v992_v59 = vsel %vm960_vm3, %v1834_v34, %v1223_v48  ;;  %v1226_v60 = vadd.f32 -1.0, %v1446_v52  ;;  %v1448_v62 = vpop.eup %1447  ;;  %1469 = vpow2.f32 %v900_v61  ;;  %v827_v16 = vmin.f32 %v1935_v1, 0.0  ;;  %v663_v50 = vpop.f32.mrf.mxu1 }
 0x13b   : > { %1024 = vst [vmem:[%s1907_s30 + $0x80] sm:$0xff] %v992_v59  ;;  %v979_v33 = vsel %vm947_vm4, %v1837_v39, %v1210_v28  ;;  %v1450_v34 = vpop.eup %1449  ;;  %v1208_v3 = vadd.f32 -1.0, %v1448_v62  ;;  %v1942_v39 = vadd.f32 %v1313_v58, %v1820_v24  ;;  %v864_v19 = vmul.f32 1.442695, %v824_v11 }
 0x13c   : > { %1011 = vst [vmem:[%s1907_s30 + $0x18] sm:$0xff] %v979_v33  ;;  %v995_v2 = vsel %vm963_vm5, %v1840_v40, %v1226_v60  ;;  %v1452_v7 = vpop.eup %1451  ;;  %v1224_v8 = vadd.f32 -1.0, %v1450_v34  ;;  %v896_v22 = vmul.f32 1.442695, %v840_v12  ;;  %vm951_vm12 = vcmp.gt.f32.partialorder %v1869_v9, 0.0  ;;  %v1301_v34 = vpop.f32.mrf.mxu0 }
 0x13d   : > { %1027 = vst [vmem:[%s1907_s30 + $0x98] sm:$0xff] %v995_v2  ;;  %v1454_v14 = vpop.eup %1453  ;;  %v977_v40 = vsel %vm945_vm6, %v1847_v53, %v1208_v3  ;;  %v1213_v15 = vadd.f32 -1.0, %v1452_v7  ;;  %v870_v26 = vmul.f32 1.442695, %v827_v16  ;;  %v843_v29 = vmin.f32 %v1942_v39, 0.0  ;;  %v1317_v7 = vpop.f32.mrf.mxu1 }
 0x13e   : > { %1009 = vst [vmem:[%s1907_s30 + $0x8] sm:$0xff] %v977_v40  ;;  %v993_v17 = vsel %vm961_vm7, %v1850_v54, %v1224_v8  ;;  %v1229_v18 = vadd.f32 -1.0, %v1454_v14  ;;  %v1456_v23 = vpop.eup %1455  ;;  %vm967_vm13 = vcmp.gt.f32.partialorder %v1872_v10, 0.0  ;;  %1471 = vpow2.f32 %v864_v19 }
 0x13f   : > { %1025 = vst [vmem:[%s1907_s30 + $0x88] sm:$0xff] %v993_v17  ;;  %v982_v53 = vsel %vm950_vm8, %v1853_v55, %v1213_v15  ;;  %v1458_v32 = vpop.eup %1457  ;;  %v1211_v35 = vadd.f32 -1.0, %v1456_v23  ;;  %1473 = vpow2.f32 %v896_v22  ;;  %v902_v38 = vmul.f32 1.442695, %v843_v29 }
 0x140   : > { %1014 = vst [vmem:[%s1907_s30 + $0x30] sm:$0xff] %v982_v53  ;;  %v998_v54 = vsel %vm966_vm9, %v1856_v56, %v1229_v18  ;;  %v1460_v37 = vpop.eup %1459  ;;  %v1227_v55 = vadd.f32 -1.0, %v1458_v32  ;;  %v1970_v41 = vadd.f32 %v1820_v24, %v586_v6  ;;  %1475 = vpow2.f32 %v870_v26  ;;  %v666_v18 = vpop.f32.mrf.mxu1 }
 0x141   : > { %1030 = vst [vmem:[%s1907_s30 + $0xb0] sm:$0xff] %v998_v54  ;;  %v1462_v42 = vpop.eup %1461  ;;  %v980_v56 = vsel %vm948_vm10, %v1863_v4, %v1211_v35  ;;  %v1214_v43 = vadd.f32 -1.0, %v1460_v37  ;;  %v1976_v44 = vadd.f32 %v1820_v24, %v650_v13  ;;  %1477 = vpow2.f32 %v902_v38 }
 0x142   : > { %1012 = vst [vmem:[%s1907_s30 + $0x20] sm:$0xff] %v980_v56  ;;  %v996_v45 = vsel %vm964_vm11, %v1866_v5, %v1227_v55  ;;  %v1230_v46 = vadd.f32 -1.0, %v1462_v42  ;;  %v825_v27 = vmin.f32 %v1970_v41, 0.0  ;;  %v1464_v48 = vpop.eup %1463  ;;  %vm949_vm14 = vcmp.gt.f32.partialorder %v1885_v20, 0.0 }
 0x143   : > { %1028 = vst [vmem:[%s1907_s30 + $0xa0] sm:$0xff] %v996_v45  ;;  %v983_v4 = vsel %vm951_vm12, %v1869_v9, %v1214_v43  ;;  %vm965_vm15 = vcmp.gt.f32.partialorder %v1888_v21, 0.0  ;;  %v841_v49 = vmin.f32 %v1976_v44, 0.0  ;;  %v1212_v52 = vadd.f32 -1.0, %v1464_v48 }
 0x144   : > { %1015 = vst [vmem:[%s1907_s30 + $0x38] sm:$0xff] %v983_v4  ;;  %v999_v51 = vsel %vm967_vm13, %v1872_v10, %v1230_v46  ;;  %v866_v57 = vmul.f32 1.442695, %v825_v27  ;;  %v1995_v28 = vadd.f32 %v1300_v30, %v1820_v24  ;;  %v1999_v60 = vadd.f32 %v1316_v36, %v1820_v24 }
 0x145   : > { %v1466_v5 = vpop.eup %1465  ;;  %1031 = vst [vmem:[%s1907_s30 + $0xb8] sm:$0xff] %v999_v51  ;;  %v898_v59 = vmul.f32 1.442695, %v841_v49  ;;  %v2002_v61 = vadd.f32 %v1820_v24, %v599_v47  ;;  %v981_v10 = vsel %vm949_vm14, %v1885_v20, %v1212_v52  ;;  %vm954_vm0 = vcmp.gt.f32.partialorder %v1892_v25, 0.0 }
 0x146   : > { %v1468_v9 = vpop.eup %1467  ;;  %v1228_v58 = vadd.f32 -1.0, %v1466_v5  ;;  %1479 = vpow2.f32 %v866_v57  ;;  %v830_v33 = vmin.f32 %v1995_v28, 0.0  ;;  %1013 = vst [vmem:[%s1907_s30 + $0x28] sm:$0xff] %v981_v10  ;;  %v846_v6 = vmin.f32 %v1999_v60, 0.0 }
 0x147   : > { %v1217_v62 = vadd.f32 -1.0, %v1468_v9  ;;  %v1470_v2 = vpop.eup %1469  ;;  %1481 = vpow2.f32 %v898_v59  ;;  %vm970_vm1 = vcmp.gt.f32.partialorder %v1896_v31, 0.0  ;;  %v828_v13 = vmin.f32 %v2002_v61, 0.0 }
 0x148   : > { %v997_v3 = vsel %vm965_vm15, %v1888_v21, %v1228_v58  ;;  %v1233_v8 = vadd.f32 -1.0, %v1470_v2  ;;  %v876_v11 = vmul.f32 1.442695, %v830_v33  ;;  %v908_v12 = vmul.f32 1.442695, %v846_v6 }
 0x149   : > { %1029 = vst [vmem:[%s1907_s30 + $0xa8] sm:$0xff] %v997_v3  ;;  %v986_v20 = vsel %vm954_vm0, %v1892_v25, %v1217_v62  ;;  %v2020_v21 = vadd.f32 %v1820_v24, %v663_v50  ;;  %v2024_v40 = vadd.f32 %v1301_v34, %v1820_v24  ;;  %v2027_v15 = vadd.f32 %v1317_v7, %v1820_v24  ;;  %v602_v25 = vpop.f32.mrf.mxu0 }
 0x14a   : > { %1018 = vst [vmem:[%s1907_s30 + $0x50] sm:$0xff] %v986_v20  ;;  %v1002_v14 = vsel %vm970_vm1, %v1896_v31, %v1233_v8  ;;  %1483 = vpow2.f32 %v876_v11  ;;  %vm952_vm2 = vcmp.gt.f32.partialorder %v1929_v63, 0.0  ;;  %v872_v16 = vmul.f32 1.442695, %v828_v13 }
 0x14b   : > { %1034 = vst [vmem:[%s1907_s30 + $0xd0] sm:$0xff] %v1002_v14  ;;  %1485 = vpow2.f32 %v908_v12  ;;  %v844_v17 = vmin.f32 %v2020_v21, 0.0  ;;  %v1472_v19 = vpop.eup %1471  ;;  %vm968_vm3 = vcmp.gt.f32.partialorder %v1932_v0, 0.0  ;;  %vm955_vm4 = vcmp.gt.f32.partialorder %v1935_v1, 0.0 }
 0x14c   : > { %v831_v31 = vmin.f32 %v2024_v40, 0.0  ;;  %v847_v22 = vmin.f32 %v2027_v15, 0.0  ;;  %v1474_v23 = vpop.eup %1473  ;;  %v1215_v53 = vadd.f32 -1.0, %v1472_v19  ;;  %1487 = vpow2.f32 %v872_v16 }
 0x14d   : > { %v904_v26 = vmul.f32 1.442695, %v844_v17  ;;  %v2037_v29 = vadd.f32 %v1820_v24, %v602_v25  ;;  %v1476_v30 = vpop.eup %1475  ;;  %v1231_v32 = vadd.f32 -1.0, %v1474_v23  ;;  %v2040_v36 = vadd.f32 %v1820_v24, %v666_v18 }
 0x14e   : > { %v878_v54 = vmul.f32 1.442695, %v831_v31  ;;  %v910_v35 = vmul.f32 1.442695, %v847_v22  ;;  %v1478_v37 = vpop.eup %1477  ;;  %v984_v55 = vsel %vm952_vm2, %v1929_v63, %v1215_v53  ;;  %v1218_v38 = vadd.f32 -1.0, %v1476_v30 }
 0x14f   : > { %1489 = vpow2.f32 %v904_v26  ;;  %v829_v42 = vmin.f32 %v2037_v29, 0.0  ;;  %1016 = vst [vmem:[%s1907_s30 + $0x40] sm:$0xff] %v984_v55  ;;  %v1000_v56 = vsel %vm968_vm3, %v1932_v0, %v1231_v32  ;;  %v1234_v43 = vadd.f32 -1.0, %v1478_v37 }
 0x150   : > { %vm971_vm5 = vcmp.gt.f32.partialorder %v1942_v39, 0.0  ;;  %1491 = vpow2.f32 %v878_v54  ;;  %1032 = vst [vmem:[%s1907_s30 + $0xc0] sm:$0xff] %v1000_v56  ;;  %v987_v24 = vsel %vm955_vm4, %v1935_v1, %v1218_v38  ;;  %v845_v45 = vmin.f32 %v2040_v36, 0.0 }
 0x151   : > { %1493 = vpow2.f32 %v910_v35  ;;  %v874_v63 = vmul.f32 1.442695, %v829_v42  ;;  %1019 = vst [vmem:[%s1907_s30 + $0x58] sm:$0xff] %v987_v24  ;;  %v1003_v46 = vsel %vm971_vm5, %v1942_v39, %v1234_v43  ;;  %vm953_vm6 = vcmp.gt.f32.partialorder %v1970_v41, 0.0 }
 0x152   : > { %1035 = vst [vmem:[%s1907_s30 + $0xd8] sm:$0xff] %v1003_v46  ;;  %v906_v0 = vmul.f32 1.442695, %v845_v45  ;;  %vm969_vm7 = vcmp.gt.f32.partialorder %v1976_v44, 0.0  ;;  %vm958_vm8 = vcmp.gt.f32.partialorder %v1995_v28, 0.0  ;;  %vm974_vm9 = vcmp.gt.f32.partialorder %v1999_v60, 0.0 }
 0x153   : > { %v1480_v27 = vpop.eup %1479  ;;  %1495 = vpow2.f32 %v874_v63  ;;  %vm956_vm10 = vcmp.gt.f32.partialorder %v2002_v61, 0.0  ;;  %vm972_vm11 = vcmp.gt.f32.partialorder %v2020_v21, 0.0  ;;  %vm959_vm12 = vcmp.gt.f32.partialorder %v2024_v40, 0.0 }
 0x154   : > { %v1482_v47 = vpop.eup %1481  ;;  %v1216_v48 = vadd.f32 -1.0, %v1480_v27  ;;  %1497 = vpow2.f32 %v906_v0  ;;  %vm975_vm13 = vcmp.gt.f32.partialorder %v2027_v15, 0.0  ;;  %vm957_vm14 = vcmp.gt.f32.partialorder %v2037_v29, 0.0 }
 0x155   : > { %v1232_v4 = vadd.f32 -1.0, %v1482_v47  ;;  %vm973_vm15 = vcmp.gt.f32.partialorder %v2040_v36, 0.0 }
 0x156   : > { %v985_v1 = vsel %vm953_vm6, %v1970_v41, %v1216_v48 }
 0x157   : > { %v1484_v49 = vpop.eup %1483  ;;  %1017 = vst [vmem:[%s1907_s30 + $0x48] sm:$0xff] %v985_v1  ;;  %v1001_v39 = vsel %vm969_vm7, %v1976_v44, %v1232_v4 }
 0x158   : > { %v1486_v50 = vpop.eup %1485  ;;  %1033 = vst [vmem:[%s1907_s30 + $0xc8] sm:$0xff] %v1001_v39  ;;  %v1221_v5 = vadd.f32 -1.0, %v1484_v49 }
 0x159   : > { %v1237_v51 = vadd.f32 -1.0, %v1486_v50  ;;  %v1488_v52 = vpop.eup %1487 }
 0x15a   : > { %v990_v57 = vsel %vm958_vm8, %v1995_v28, %v1221_v5  ;;  %v1219_v9 = vadd.f32 -1.0, %v1488_v52 }
 0x15b   : > { %1022 = vst [vmem:[%s1907_s30 + $0x70] sm:$0xff] %v990_v57  ;;  %v1006_v41 = vsel %vm974_vm9, %v1999_v60, %v1237_v51 }
 0x15c   : > { %v1490_v58 = vpop.eup %1489  ;;  %1038 = vst [vmem:[%s1907_s30 + $0xf0] sm:$0xff] %v1006_v41  ;;  %v988_v59 = vsel %vm956_vm10, %v2002_v61, %v1219_v9 }
 0x15d   : > { %v1492_v44 = vpop.eup %1491  ;;  %v1235_v10 = vadd.f32 -1.0, %v1490_v58  ;;  %1020 = vst [vmem:[%s1907_s30 + $0x60] sm:$0xff] %v988_v59 }
 0x15e   : > { %v1494_v62 = vpop.eup %1493  ;;  %v1222_v28 = vadd.f32 -1.0, %v1492_v44 }
 0x15f   : > { %v1004_v60 = vsel %vm972_vm11, %v2020_v21, %v1235_v10  ;;  %v1238_v33 = vadd.f32 -1.0, %v1494_v62 }
 0x160   : > { %v1496_v34 = vpop.eup %1495  ;;  %1036 = vst [vmem:[%s1907_s30 + $0xe0] sm:$0xff] %v1004_v60  ;;  %v991_v2 = vsel %vm959_vm12, %v2024_v40, %v1222_v28 }
 0x161   : > { %1023 = vst [vmem:[%s1907_s30 + $0x78] sm:$0xff] %v991_v2  ;;  %v1007_v61 = vsel %vm975_vm13, %v2027_v15, %v1238_v33  ;;  %v1220_v3 = vadd.f32 -1.0, %v1496_v34  ;;  %v1498_v6 = vpop.eup %1497 }
 0x162   : > { %1039 = vst [vmem:[%s1907_s30 + $0xf8] sm:$0xff] %v1007_v61  ;;  %v1236_v20 = vadd.f32 -1.0, %v1498_v6 }
 0x163   : > { %v989_v7 = vsel %vm957_vm14, %v2037_v29, %v1220_v3 }
 0x164   : > { %1021 = vst [vmem:[%s1907_s30 + $0x68] sm:$0xff] %v989_v7  ;;  %v1005_v8 = vsel %vm973_vm15, %v2040_v36, %v1236_v20 }
 0x165   : > { %1037 = vst [vmem:[%s1907_s30 + $0xe8] sm:$0xff] %v1005_v8 }
 0x166   : > { %1566 = shalt.err (!%p1563_p5)
}
 0x167   : > { %s1567_s4 = scalar_lea.hbm %s2090_s10, 4096  ;;  %s1571_s20 = scalar_lea.hbm %s2147_s3, 8192 }
 0x168   : > { %p1568_p7 = scmp.ne.s32.totalorder %s2090_s10, %s1567_s4  ;;  %p1572_p9 = scmp.lt.s32.totalorder %s2090_s10, %s2147_s3 }
 0x169   : > { %p1573_p11 = scmp.lt.s32.totalorder %s1571_s20, %s1567_s4 }
 0x16a   : > { %p1569_p4 = pnand %p1568_p7, %p1756_p13 }
 0x16b   : > { %p1574_p10 = por %p1573_p11, %p1572_p9 }
 0x16c   : > { %p1570_p6 = pneg %p1569_p4 }
 0x16e   : > { %p1575_p1 = pnand %p1574_p10, %p1570_p6 }
 0x170   : > { %1578 = shalt.err (!%p1575_p1)
}
 0x171   : > { %s1644_s30 = smov 128   ;;  %s1645_s29 = smov 8  }
 0x172   : > { %1340 = dma.vmem_to_hbm [thread:$0]  (%p1756_p13), %s2092_s5, 4096, %s2090_s10, %s1041_s15, %s1644_s30, %s1644_s30, %s1645_s29  }
 0x173 PF: > { %s1070_s6 = sand.u32 1, %s1617_s12   ;;  %p2163_p8 = scmp.ne.s32.totalorder %s2154_s23, 0 }
 0x174   : > { %p2164_p12 = scmp.ge.s32.totalorder %s1637_s17, 2  ;;  %s1071_s21 = scalar_lea.sflag [#allocation5], %s1070_s6 }
 0x176   : > { %p1351_p0 = pnand %p2164_p12, %p2163_p8 }
 0x178   : > { %p1352_p2 = pneg %p1351_p0 }
 0x17a   : > { %1612 = dma.done.wait (%p1352_p2), %s1071_s21, 4096  }
 0x17b   : > { %1614 = vsyncadd (%p1352_p2), %s1071_s21, 4294963200  ;;  %s20_s17 = sadd.s32 1, %s1637_s17   ;;  %s2165_s12 = smov %s1621_s13 }
 0x17c   : > { %p17_p3 = scmp.ge.s32.totalorder %s20_s17, 4   ;;  %s2166_s13 = smov %s1625_s14 }
 0x17d   : > { %s2167_s14 = smov %s1765_s19  ;;  %s2168_s15 = smov %s1633_s16 }
 0x17e   : > { %s2169_s16 = smov %s2171_s28  ;;  %19 = sbr.rel (!%p17_p3) target bundleno = 7 (0x7), region = 93 }
 0x183   :  { %1076 = vsyncpa [#allocation4], 1 }
 0x184   :  { %1078 = vsyncpa [#allocation4 + $0x1], 1 }
 0x185   :  { %1079 = vsyncpa [#allocation7], 1 }
 0x186   :  { %1080 = vsyncpa [#allocation5], 1 }
 0x187   :  { %1082 = vsyncpa [#allocation5 + $0x1], 1 }

</bundles_post_ra>
